<compile_context>
chip_gen: v7x
topology: tpu7x:2x2x1
jax: 0.10.0
libtpu: 0.0.40
codegen_flags: <defaults>
</compile_context>

<pallas_src>
import functools
import math

import jax
import jax.numpy as jnp
from jax.experimental import pallas as pl
from jax.experimental.pallas import tpu as pltpu

_INV_SQRT2 = 1.0 / math.sqrt(2.0)


def _round_up(x: int, m: int) -> int:
    return ((x + m - 1) // m) * m


def _pick_tile(dim: int, base: int, target: int):
    """Largest multiple of `base` that divides round_up(dim, base) and is <= target."""
    padded = _round_up(dim, base)
    units = padded // base
    best = 1
    for d in range(min(target // base, units), 0, -1):
        if units % d == 0:
            best = d
            break
    return best * base, padded


def _intermediate_kernel(x_ref, w_ref, b_ref, o_ref, acc_ref, *, compute_dtype):
    # x_ref: (tm, tk)  w_ref: (tn, tk)  b_ref: (1, tn)  o_ref: (tm, tn)
    # acc_ref: (tm, tn) f32 scratch, resident across the K axis.
    k = pl.program_id(2)

    @pl.when(k == 0)
    def _():
        acc_ref[...] = jnp.zeros_like(acc_ref)

    x = x_ref[...]
    w = w_ref[...]
    if compute_dtype is not None:
        x = x.astype(compute_dtype)
        w = w.astype(compute_dtype)

    # Contract last dims of both operands: (tm, tk) x (tn, tk) -> (tm, tn),
    # i.e. x @ W^T without transposing W in the wrapper.
    acc_ref[...] += jax.lax.dot_general(
        x, w,
        dimension_numbers=(((1,), (1,)), ((), ())),
        preferred_element_type=jnp.float32,
    )

    @pl.when(k == pl.num_programs(2) - 1)
    def _():
        acc = acc_ref[...] + b_ref[...].astype(jnp.float32)
        # Exact GELU (erf form), matching torch.nn.functional.gelu / ACT2FN["gelu"].
        act = 0.5 * acc * (1.0 + jax.lax.erf(acc * _INV_SQRT2))
        o_ref[...] = act.astype(o_ref.dtype)


def diffuser_intermediate(hidden_states, weight, bias, *,
                          tm=256, tn=512, tk=512, compute_dtype=None):
    """hidden_states: [B, S, H]; weight: [I, H] (PyTorch layout); bias: [I]."""
    B, S, H = hidden_states.shape
    I, H_w = weight.shape
    assert H_w == H, "weight must be [intermediate, hidden]"
    M = B * S

    # Tile sizes: multiples of hardware minima, clamped to (padded) problem size.
    tm, _ = _pick_tile(M, 8, tm)      # sublane-aligned row tile
    tn, Ip = _pick_tile(I, 128, tn)   # lane-aligned output tile (unmasked stores)
    tk, Hp = _pick_tile(H, 128, tk)   # lane-aligned reduction tile
    Mp = _round_up(M, tm)

    x2d = hidden_states.reshape(M, H)
    if (Mp, Hp) != (M, H):
        x2d = jnp.pad(x2d, ((0, Mp - M), (0, Hp - H)))
    w = weight
    if (Ip, Hp) != (I, H):
        w = jnp.pad(w, ((0, Ip - I), (0, Hp - H)))
    b2d = bias.reshape(1, I)
    if Ip != I:
        b2d = jnp.pad(b2d, ((0, 0), (0, Ip - I)))

    grid = (Mp // tm, Ip // tn, Hp // tk)
    kernel = functools.partial(_intermediate_kernel, compute_dtype=compute_dtype)

    out2d = pl.pallas_call(
        kernel,
        out_shape=jax.ShapeDtypeStruct((Mp, Ip), hidden_states.dtype),
        grid_spec=pltpu.PrefetchScalarGridSpec(
            num_scalar_prefetch=0,
            grid=grid,
            in_specs=[
                pl.BlockSpec((tm, tk), lambda i, j, k: (i, k)),   # x row/K tile
                pl.BlockSpec((tn, tk), lambda i, j, k: (j, k)),   # W[I, H] tile
                pl.BlockSpec((1, tn), lambda i, j, k: (0, j)),    # bias tile
            ],
            out_specs=pl.BlockSpec((tm, tn), lambda i, j, k: (i, j)),
            scratch_shapes=[pltpu.VMEM((tm, tn), jnp.float32)],
        ),
        compiler_params=pltpu.CompilerParams(
            dimension_semantics=("parallel", "parallel", "arbitrary"),
            vmem_limit_bytes=48 * 1024 * 1024,
        ),
    )(x2d, w, b2d)

    return out2d[:M, :I].reshape(B, S, I)


if __name__ == "__main__":
    # Small config: hidden_size=32, intermediate_size=128, batch=2, seq=8.
    B, S, H, I = 2, 8, 32, 128

    key = jax.random.PRNGKey(0)
    kx, kw, kb = jax.random.split(key, 3)

    hidden_states = jax.random.normal(kx, (B, S, H), dtype=jnp.float32)
    # Deterministic "Linear" parameters (PyTorch weight layout: [out, in]).
    weight = jax.random.normal(kw, (I, H), dtype=jnp.float32) * (1.0 / math.sqrt(H))
    bias = jax.random.normal(kb, (I,), dtype=jnp.float32) * 0.02

    out = diffuser_intermediate(hidden_states, weight, bias)
    out = jax.block_until_ready(out)

    # Cross-check against plain JAX reference (exact GELU).
    ref = jax.nn.gelu(hidden_states @ weight.T + bias, approximate=False)
    assert out.shape == (B, S, I)
    assert jnp.allclose(out, ref, atol=2e-5, rtol=2e-5)

    print("KERNEL_OK")
</pallas_src>

<mosaic_0001>
module attributes {stable_mosaic.version = 11 : i64} {
  func.func @_intermediate_kernel(%arg0: i32, %arg1: i32, %arg2: i32, %arg3: memref<16x128xf32, #tpu.memory_space<vmem>>, %arg4: memref<128x128xf32, #tpu.memory_space<vmem>>, %arg5: memref<1x128xf32, #tpu.memory_space<vmem>>, %arg6: memref<16x128xf32, #tpu.memory_space<vmem>>, %arg7: memref<16x128xf32, #tpu.memory_space<vmem>>) attributes {dimension_semantics = [#tpu.dimension_semantics<parallel>, #tpu.dimension_semantics<parallel>, #tpu.dimension_semantics<arbitrary>], iteration_bounds = array<i64: 1, 1, 1>, scalar_prefetch = 0 : i64, scratch_operands = 1 : i64, tpu.core_type = #tpu.core_type<tc>, window_params = [{transform_indices = @transform_0, window_bounds = array<i64: 16, 128>}, {transform_indices = @transform_1, window_bounds = array<i64: 128, 128>}, {transform_indices = @transform_2, window_bounds = array<i64: 1, 128>}, {transform_indices = @transform_3, window_bounds = array<i64: 16, 128>}]} {
    %c0_i32 = arith.constant 0 : i32
    %0 = arith.cmpi eq, %arg2, %c0_i32 : i32
    %1 = arith.extui %0 : i1 to i32
    %c0_i32_0 = arith.constant 0 : i32
    %2 = arith.cmpi ne, %1, %c0_i32_0 : i32
    scf.if %2 {
      %cst_10 = arith.constant 0.000000e+00 : f32
      %12 = vector.broadcast %cst_10 : f32 to vector<16x128xf32>
      %c0_11 = arith.constant 0 : index
      %c0_12 = arith.constant 0 : index
      %13 = vector.load %arg7[%c0_11, %c0_12] : memref<16x128xf32, #tpu.memory_space<vmem>>, vector<16x128xf32>
      tpu.vector_store %arg7[%c0_11, %c0_12], %12 {strides = array<i32>} : memref<16x128xf32, #tpu.memory_space<vmem>>, vector<16x128xf32>,
    } else {
    }
    %c0 = arith.constant 0 : index
    %c0_1 = arith.constant 0 : index
    %3 = vector.load %arg3[%c0, %c0_1] : memref<16x128xf32, #tpu.memory_space<vmem>>, vector<16x128xf32>
    %c0_2 = arith.constant 0 : index
    %c0_3 = arith.constant 0 : index
    %4 = vector.load %arg4[%c0_2, %c0_3] : memref<128x128xf32, #tpu.memory_space<vmem>>, vector<128x128xf32>
    %c0_4 = arith.constant 0 : index
    %c0_5 = arith.constant 0 : index
    %5 = vector.load %arg7[%c0_4, %c0_5] : memref<16x128xf32, #tpu.memory_space<vmem>>, vector<16x128xf32>
    %cst = arith.constant dense<0.000000e+00> : vector<16x128xf32>
    %6 = tpu.matmul %3, %4, %cst {dimension_numbers = #tpu.dot_dimension_numbers<[1], [1], [0], [0], [0, 0, 1, 0], [], []>} : vector<16x128xf32>, vector<128x128xf32>, vector<16x128xf32> -> vector<16x128xf32>
    %7 = arith.addf %5, %6 : vector<16x128xf32>
    %c0_6 = arith.constant 0 : index
    %c0_7 = arith.constant 0 : index
    %8 = vector.load %arg7[%c0_6, %c0_7] : memref<16x128xf32, #tpu.memory_space<vmem>>, vector<16x128xf32>
    tpu.vector_store %arg7[%c0_6, %c0_7], %7 {strides = array<i32>} : memref<16x128xf32, #tpu.memory_space<vmem>>, vector<16x128xf32>,
    %c0_i32_8 = arith.constant 0 : i32
    %9 = arith.cmpi eq, %arg2, %c0_i32_8 : i32
    %10 = arith.extui %9 : i1 to i32
    %c0_i32_9 = arith.constant 0 : i32
    %11 = arith.cmpi ne, %10, %c0_i32_9 : i32
    scf.if %11 {
      %c0_10 = arith.constant 0 : index
      %c0_11 = arith.constant 0 : index
      %12 = vector.load %arg7[%c0_10, %c0_11] : memref<16x128xf32, #tpu.memory_space<vmem>>, vector<16x128xf32>
      %c0_12 = arith.constant 0 : index
      %c0_13 = arith.constant 0 : index
      %13 = vector.load %arg5[%c0_12, %c0_13] : memref<1x128xf32, #tpu.memory_space<vmem>>, vector<1x128xf32>
      %14 = vector.broadcast %13 : vector<1x128xf32> to vector<16x128xf32>
      %15 = arith.addf %12, %14 : vector<16x128xf32>
      %cst_14 = arith.constant 5.000000e-01 : f32
      %16 = vector.broadcast %cst_14 : f32 to vector<16x128xf32>
      %17 = arith.mulf %16, %15 : vector<16x128xf32>
      %cst_15 = arith.constant 0.707106769 : f32
      %18 = vector.broadcast %cst_15 : f32 to vector<16x128xf32>
      %19 = arith.mulf %15, %18 : vector<16x128xf32>
      %20 = math.erf %19 : vector<16x128xf32>
      %cst_16 = arith.constant 1.000000e+00 : f32
      %21 = vector.broadcast %cst_16 : f32 to vector<16x128xf32>
      %22 = arith.addf %21, %20 : vector<16x128xf32>
      %23 = arith.mulf %17, %22 : vector<16x128xf32>
      %c0_17 = arith.constant 0 : index
      %c0_18 = arith.constant 0 : index
      %24 = vector.load %arg6[%c0_17, %c0_18] : memref<16x128xf32, #tpu.memory_space<vmem>>, vector<16x128xf32>
      tpu.vector_store %arg6[%c0_17, %c0_18], %23 {strides = array<i32>} : memref<16x128xf32, #tpu.memory_space<vmem>>, vector<16x128xf32>,
    } else {
    }
    return
  }
  func.func @transform_0(%arg0: i32, %arg1: i32, %arg2: i32) -> (i32, i32) {
    %c0_i32 = arith.constant 0 : i32
    return %arg0, %arg2 : i32, i32
  }
  func.func @transform_1(%arg0: i32, %arg1: i32, %arg2: i32) -> (i32, i32) {
    %c0_i32 = arith.constant 0 : i32
    return %arg1, %arg2 : i32, i32
  }
  func.func @transform_2(%arg0: i32, %arg1: i32, %arg2: i32) -> (i32, i32) {
    %c0_i32 = arith.constant 0 : i32
    %c0_i32_0 = arith.constant 0 : i32
    return %c0_i32, %arg1 : i32, i32
  }
  func.func @transform_3(%arg0: i32, %arg1: i32, %arg2: i32) -> (i32, i32) {
    %c0_i32 = arith.constant 0 : i32
    return %arg0, %arg1 : i32, i32
  }
}

</mosaic_0001>

<bundles_post_ra>
// kernel: tpu_custom_call.1
= control target key start
LH: loop header
LB: loop body
LE: loop exit
PB: predicated region body
PF: predicated region fallthrough
CT: control target
= control target key end

     0   :  { %8 = vsyncpa [#allocation4], 0  ;;  %s432_s0 = inlined_call_operand.hbm [shape: f32[16,128], index: 0, kind: input, shape index: {}]   ;;  %s433_s1 = inlined_call_operand.hbm [shape: f32[128,128], index: 1, kind: input, shape index: {}]   ;;  %s434_s2 = inlined_call_operand.vmem [shape: f32[1,128], index: 2, kind: input, shape index: {}]   ;;  %s435_s3 = inlined_call_operand.hbm [shape: f32[16,128], index: 3, kind: output, shape index: {}]  }
   0x1   :  { %9 = vsyncpa [#allocation7], 0 }
   0x2   :  { %10 = vsyncpa [#allocation5], 0  ;;  %s359_s12 = smov [#allocation3]   ;;  %s287_s16 = scalar_lea.hbm %s432_s0, 256 }
   0x3   :  { %s16_s13 = sshll.u32 %s359_s12, 4  ;;  %p288_p0 = scmp.ne.s32.totalorder %s432_s0, %s287_s16  ;;  %s17_s13 = int_to_ptr.vmem [resolvable:$true] %s16_s13 }
   0x4   :  { %p291_p1 = scmp.lt.u32.totalorder %s287_s16, %s432_s0 }
   0x6   :  { %p293_p2 = pnand %p291_p1, %p288_p0 }
   0x8   :  { %296 = shalt.err (!%p293_p2)
}
   0x9   :  { %s297_s21 = scalar_lea.vmem %s17_s13, 256  ;;  %p302_p4 = scmp.lt.s32.totalorder %s17_s13, %s17_s13 }
   0xa   :  { %p298_p3 = scmp.ne.s32.totalorder %s17_s13, %s297_s21  ;;  %p303_p5 = scmp.lt.s32.totalorder %s297_s21, %s297_s21 }
   0xc   :  { %p304_p6 = por %p303_p5, %p302_p4 }
   0xe   :  { %p305_p7 = pnand %p304_p6, %p298_p3 }
  0x10   :  { %308 = shalt.err (!%p305_p7)
}
  0x11   :  { %s360_s22 = smov 128   ;;  %s361_s23 = smov 8  }
  0x12   :  { %22 = dma.hbm_to_vmem [thread:$0]  %s432_s0, 256, %s17_s13, [#allocation4], %s360_s22, %s360_s22, %s361_s23  }
  0x13   :  { %s362_s26 = smov [#allocation6]   ;;  %s309_s30 = scalar_lea.hbm %s433_s1, 2048 }
  0x14   :  { %s28_s27 = sshll.u32 %s362_s26, 4  ;;  %p310_p8 = scmp.ne.s32.totalorder %s433_s1, %s309_s30  ;;  %s29_s27 = int_to_ptr.vmem [resolvable:$true] %s28_s27 }
  0x15   :  { %p313_p9 = scmp.lt.u32.totalorder %s309_s30, %s433_s1 }
  0x17   :  { %p315_p10 = pnand %p313_p9, %p310_p8 }
  0x19   :  { %318 = shalt.err (!%p315_p10)
}
  0x1a   :  { %s319_s8 = scalar_lea.vmem %s29_s27, 2048  ;;  %p324_p12 = scmp.lt.s32.totalorder %s29_s27, %s29_s27 }
  0x1b   :  { %p320_p11 = scmp.ne.s32.totalorder %s29_s27, %s319_s8  ;;  %p325_p13 = scmp.lt.s32.totalorder %s319_s8, %s319_s8 }
  0x1d   :  { %p326_p0 = por %p325_p13, %p324_p12 }
  0x1f   :  { %p327_p1 = pnand %p326_p0, %p320_p11 }
  0x21   :  { %330 = shalt.err (!%p327_p1)
}
  0x22   :  { %34 = dma.hbm_to_vmem [thread:$0]  %s433_s1, 2048, %s29_s27, [#allocation7], %s360_s22, %s360_s22, %s361_s23  }
  0x23   :  { %353 = dma.done.wait [#allocation4], 256  }
  0x24   :  { %354 = vsyncadd [#allocation4], 4294967040 }
  0x25   :  { %355 = dma.done.wait [#allocation7], 2048  }
  0x26   :  { %356 = vsyncadd [#allocation7], 4294965248  ;;  %v51_v0 = vld [vmem:[#allocation6] sm:$0xff]  ;;  %v52_v1 = vld [vmem:[#allocation6 + $0x8] sm:$0xff]  ;;  %s363_s11 = smov [#allocation8]  }
  0x27   :  { %v53_v2 = vld [vmem:[#allocation6 + $0x10] sm:$0xff]  ;;  %v246_v3 = vpack.c.bf16 %v52_v1, %v51_v0  ;;  %v54_v4 = vld [vmem:[#allocation6 + $0x18] sm:$0xff]  ;;  %v55_v7 = vld [vmem:[#allocation6 + $0x20] sm:$0xff]  ;;  %s179_s12 = sshll.u32 %s363_s11, 4  ;;  %s180_s12 = int_to_ptr.vmem [resolvable:$true] %s179_s12 }
  0x28   :  { %v250_v5 = vpack.c.bf16 %v54_v4, %v53_v2  ;;  %v49_v6 = vld [vmem:[#allocation3] sm:$0xff]  ;;  %v56_v8 = vld [vmem:[#allocation6 + $0x28] sm:$0xff]  ;;  %v58_v11 = vld [vmem:[#allocation6 + $0x38] sm:$0xff]  ;;  %p336_p3 = scmp.lt.s32.totalorder %s180_s12, %s180_s12 }
  0x29   :  { %247 = vmatprep.subr.bf16.mxu0 %v246_v3  ;;  %243 = vmatprep.mubr.f32.mxu0 %v49_v6  ;;  %v254_v9 = vpack.c.bf16 %v56_v8, %v55_v7  ;;  %v57_v10 = vld [vmem:[#allocation6 + $0x30] sm:$0xff]  ;;  %v59_v13 = vld [vmem:[#allocation6 + $0x40] sm:$0xff]  ;;  %v60_v14 = vld [vmem:[#allocation6 + $0x48] sm:$0xff] }
  0x2a   :  { %249 = vmatpush3.bf16.xpose.msra.mxu0 %v246_v3  ;;  %v258_v12 = vpack.c.bf16 %v58_v11, %v57_v10  ;;  %v262_v15 = vpack.c.bf16 %v60_v14, %v59_v13  ;;  %v61_v16 = vld [vmem:[#allocation6 + $0x50] sm:$0xff]  ;;  %v62_v17 = vld [vmem:[#allocation6 + $0x58] sm:$0xff]  ;;  %v63_v19 = vld [vmem:[#allocation6 + $0x60] sm:$0xff] }
  0x2b   :  { %251 = vmatprep.subr.bf16.mxu0 %v250_v5  ;;  %v266_v18 = vpack.c.bf16 %v62_v17, %v61_v16  ;;  %v64_v20 = vld [vmem:[#allocation6 + $0x68] sm:$0xff]  ;;  %v65_v22 = vld [vmem:[#allocation6 + $0x70] sm:$0xff]  ;;  %v66_v23 = vld [vmem:[#allocation6 + $0x78] sm:$0xff] }
  0x2c   :  { %v270_v21 = vpack.c.bf16 %v64_v20, %v63_v19  ;;  %v274_v24 = vpack.c.bf16 %v66_v23, %v65_v22  ;;  %v50_v25 = vld [vmem:[#allocation3 + $0x8] sm:$0xff]  ;;  %v192_v26 = vld [vmem:[%s434_s2] ss:$0 sm:$0xff]  ;;  %s331_s2 = scalar_lea.vmem %s180_s12, 256 }
  0x2d   :  { %p332_p2 = scmp.ne.s32.totalorder %s180_s12, %s331_s2  ;;  %p337_p4 = scmp.lt.s32.totalorder %s331_s2, %s331_s2 }
  0x2f   :  { %p338_p5 = por %p337_p4, %p336_p3 }
  0x31   :  { %p339_p6 = pnand %p338_p5, %p332_p2 }
  0x32   :  { %253 = vmatpush3.bf16.xpose.msra.mxu0 %v250_v5 }
  0x33   :  { %255 = vmatprep.subr.bf16.mxu0 %v254_v9 }
  0x3a   :  { %257 = vmatpush3.bf16.xpose.msra.mxu0 %v254_v9 }
  0x3b   :  { %259 = vmatprep.subr.bf16.mxu0 %v258_v12 }
  0x42   :  { %261 = vmatpush3.bf16.xpose.msra.mxu0 %v258_v12 }
  0x43   :  { %263 = vmatprep.subr.bf16.mxu0 %v262_v15 }
  0x4a   :  { %265 = vmatpush3.bf16.xpose.msra.mxu0 %v262_v15 }
  0x4b   :  { %267 = vmatprep.subr.bf16.mxu0 %v266_v18 }
  0x52   :  { %269 = vmatpush3.bf16.xpose.msra.mxu0 %v266_v18 }
  0x53   :  { %271 = vmatprep.subr.bf16.mxu0 %v270_v21 }
  0x5a   :  { %273 = vmatpush3.bf16.xpose.msra.mxu0 %v270_v21 }
  0x5b   :  { %275 = vmatprep.subr.bf16.mxu0 %v274_v24 }
  0x62   :  { %277 = vmatpush3.bf16.xpose.msra.mxu0 %v274_v24 }
  0x69   :  { %244 = vmatmul.mubr.f32.vlgmr.msra.gmra.mrb[0].mxu0 %v50_v25 }
 0x13c   :  { %v245_v27 = vpop.f32.mrb[0].mxu0 }
 0x13d   :  { %v161_v28 = vadd.f32 %v245_v27, %v192_v26  ;;  %v135_v29 = vpop.f32.mrb[1].mxu0 }
 0x13e   :  { %v160_v30 = vadd.f32 %v192_v26, %v135_v29 }
 0x13f   :  { %v165_v31 = vmul.f32 0.70710677, %v161_v28  ;;  %v163_v35 = vmul.f32 0.5, %v161_v28 }
 0x140   :  { %v164_v32 = vmul.f32 0.70710677, %v160_v30  ;;  %v162_v37 = vmul.f32 0.5, %v160_v30 }
 0x141   :  { %283 = verf.f32 %v165_v31 }
 0x142   :  { %285 = verf.f32 %v164_v32 }
 0x14b   :  { %v284_v33 = vpop.eup %283 }
 0x14c   :  { %v286_v34 = vpop.eup %285  ;;  %v169_v36 = vadd.f32 1.0, %v284_v33 }
 0x14d   :  { %v168_v38 = vadd.f32 1.0, %v286_v34 }
 0x14e   :  { %v171_v39 = vmul.f32 %v169_v36, %v163_v35 }
 0x14f   :  { %v170_v40 = vmul.f32 %v168_v38, %v162_v37 }
 0x150   :  { %173 = vst [vmem:[#allocation8 + $0x8] sm:$0xff] %v171_v39 }
 0x151   :  { %172 = vst [vmem:[#allocation8] sm:$0xff] %v170_v40 }
 0x152   :  { %342 = shalt.err (!%p339_p6)
}
 0x153   :  { %s343_s15 = scalar_lea.hbm %s435_s3, 256 }
 0x154   :  { %p344_p7 = scmp.ne.s32.totalorder %s435_s3, %s343_s15  ;;  %p347_p8 = scmp.lt.u32.totalorder %s343_s15, %s435_s3 }
 0x156   :  { %p349_p9 = pnand %p347_p8, %p344_p7 }
 0x158   :  { %352 = shalt.err (!%p349_p9)
}
 0x159   :  { %185 = dma.vmem_to_hbm [thread:$0]  %s180_s12, 256, %s435_s3, [#allocation5], %s360_s22, %s360_s22, %s361_s23  }
 0x15a   :  { %357 = dma.done.wait [#allocation5], 256  }
 0x15b   :  { %358 = vsyncadd [#allocation5], 4294967040 }
 0x15c   :  { %189 = vsyncpa [#allocation4], 1 }
 0x15d   :  { %190 = vsyncpa [#allocation7], 1 }
 0x15e   :  { %191 = vsyncpa [#allocation5], 1 }

</bundles_post_ra>
